<compile_context>
chip_gen: v7x
topology: tpu7x:2x2x1
jax: 0.10.0
libtpu: 0.0.40
codegen_flags: <defaults>
</compile_context>

<pallas_src>
import math
from functools import partial

import jax
import jax.numpy as jnp
from jax.experimental import pallas as pl
from jax.experimental.pallas import tpu as pltpu


def _round_up(x, m):
    return ((x + m - 1) // m) * m


def _cdiv(a, b):
    return (a + b - 1) // b


def _vmem_physical_bytes():
    """Physical VMEM per TensorCore; conservative 64 MiB (v7x) fallback."""
    try:
        info = pltpu.get_tpu_info()
        for attr in ("vmem_capacity_bytes", "vmem_bytes", "vmem_size_bytes"):
            v = getattr(info, attr, None)
            if isinstance(v, int) and v > 0:
                return v
    except Exception:
        pass
    return 64 * 1024 * 1024


def _gelu_exact_f32(h):
    # torch nn.GELU() default: 0.5*h*(1 + erf(h/sqrt(2))), computed in f32.
    return 0.5 * h * (1.0 + jax.lax.erf(h * jnp.float32(0.7071067811865476)))


def _gelu_tanh_f32(h):
    # tanh approximation (transcendental goes to the otherwise-idle EUP slot).
    # NOTE: deviates slightly from torch nn.GELU() default (exact erf).
    c = jnp.float32(0.7978845608028654)  # sqrt(2/pi)
    return 0.5 * h * (1.0 + jnp.tanh(c * (h + jnp.float32(0.044715) * (h * h * h))))


def _ffn_kernel_resident(x_ref, w1t_ref, b1_ref, w2t_ref, b2_ref, o_ref, *, gelu):
    """One token tile; weight slabs are grid-constant (fetched from HBM once)."""
    x = x_ref[...]                                                  # (tm, Dp)
    h = jnp.dot(x, w1t_ref[...], preferred_element_type=jnp.float32) + b1_ref[...]
    g = gelu(h)                                                     # f32
    o_ref[...] = (jnp.dot(g.astype(x.dtype), w2t_ref[...],
                          preferred_element_type=jnp.float32)
                  + b2_ref[...]).astype(o_ref.dtype)


def _ffn_kernel_chunked(x_ref, w1t_ref, b1_ref, w2t_ref, b2_ref, o_ref, acc_ref, *, gelu):
    """One (token-tile, hidden-chunk) step with an f32 accumulator over chunks."""
    k = pl.program_id(1)

    @pl.when(k == 0)
    def _init():
        acc_ref[...] = jnp.zeros_like(acc_ref)

    x = x_ref[...]                                                  # (tm, Dp)
    h = jnp.dot(x, w1t_ref[...], preferred_element_type=jnp.float32) + b1_ref[...]
    g = gelu(h)                                                     # (tm, th) f32
    acc_ref[...] += jnp.dot(g.astype(x.dtype), w2t_ref[...],
                            preferred_element_type=jnp.float32)

    @pl.when(k == pl.num_programs(1) - 1)
    def _finalize():
        o_ref[...] = (acc_ref[...] + b2_ref[...]).astype(o_ref.dtype)


def make_feed_forward(w1, b1, w2, b2, *, compute_dtype=jnp.bfloat16,
                      approx_gelu=False, out_dtype=None,
                      vmem_limit_bytes=None, interpret=False):
    """Prepares (pads/transposes/casts) weights once and returns forward(x).

    w1, w2: (D, D) in PyTorch nn.Linear layout (out, in).  b1, b2: (D,).
    """
    D = w1.shape[0]
    assert w1.shape == (D, D) and w2.shape == (D, D)
    assert b1.shape == (D,) and b2.shape == (D,)

    cbytes = jnp.dtype(compute_dtype).itemsize
    plan_obytes = jnp.dtype(out_dtype).itemsize if out_dtype is not None else 4

    phys = _vmem_physical_bytes()
    if vmem_limit_bytes is None:
        vmem_limit_bytes = (phys * 7) // 8            # 56 MiB on v7x, 112 MiB on v5e/v6e
    budget = min(vmem_limit_bytes, (phys * 3) // 4)   # working-set planning target

    # -------- Plan Dp / th / residency (depends only on D, dtypes, budget). --------
    Dp = _round_up(D, 128)                            # lane-dense feature dim

    # Resident-weight working set: 2 slabs x 2 pipeline buffers each (grid-constant
    # index -> only ONE HBM fetch, but the pipeline still allocates double buffers)
    # plus the f32 biases.
    resident_w_bytes = 4 * Dp * Dp * cbytes + 16 * Dp
    min_tile_bytes = 8 * Dp * (2 * cbytes + 2 * plan_obytes)   # x/out at the 8-row minimum
    resident = resident_w_bytes + min_tile_bytes <= budget

    if resident:
        th = Dp
    else:
        # Streaming path: hidden-chunk width (multiple of 128, divides Dp, >= 256
        # for MXU N-dim efficiency).  Re-pad Dp when its only divisor is 128.
        def _th_cands(dp):
            return [c for c in range(min(512, dp), 127, -128) if dp % c == 0]

        cands = _th_cands(Dp)
        if max(cands) < 256 and Dp > 256:
            Dp = _round_up(Dp, 512)
            cands = _th_cands(Dp)
        th = cands[-1]
        for c in cands:  # descending: largest chunk whose double-buffered slabs
            if 4 * Dp * c * cbytes <= budget // 2:    # leave >= half budget for x/out/acc
                th = c
                break

    # -------- Hoisted weight prep: transpose + pad + cast, done exactly once. --------
    w1t = jnp.zeros((Dp, Dp), dtype=compute_dtype).at[:D, :D].set(
        jnp.asarray(w1).T.astype(compute_dtype))
    w2t = jnp.zeros((Dp, Dp), dtype=compute_dtype).at[:D, :D].set(
        jnp.asarray(w2).T.astype(compute_dtype))
    b1p = jnp.zeros((1, Dp), dtype=jnp.float32).at[0, :D].set(
        jnp.asarray(b1).astype(jnp.float32))
    b2p = jnp.zeros((1, Dp), dtype=jnp.float32).at[0, :D].set(
        jnp.asarray(b2).astype(jnp.float32))

    gelu = _gelu_tanh_f32 if approx_gelu else _gelu_exact_f32

    def forward(x):
        assert x.shape[-1] == D
        orig_shape = x.shape
        out_dt = jnp.dtype(out_dtype) if out_dtype is not None else x.dtype
        obytes = jnp.dtype(out_dt).itemsize

        x2 = x.reshape(-1, D)
        N = x2.shape[0]

        # ---- Token tile: snug fit, >= 2 tiles for v7x megacore, VMEM-bounded. ----
        if resident:
            fixed = resident_w_bytes
            per_row = Dp * (2 * cbytes + 2 * obytes)             # x + out, double-buffered
            tm_target = 256
        else:
            fixed = 4 * Dp * th * cbytes + 8 * th + 8 * Dp       # weight chunks + biases
            per_row = Dp * (2 * cbytes + 2 * obytes + 4)         # + f32 accumulator row
            tm_target = 1024                                     # raise flops / weight byte
        min_tiles = 2 if N > 8 else 1
        n_tiles = max(min_tiles, _cdiv(N, tm_target))
        tm = _round_up(_cdiv(N, n_tiles), 8)
        tm_fit = max(8, ((budget - fixed) // per_row) // 8 * 8)
        tm = max(8, min(tm, tm_fit))
        Np = _cdiv(N, tm) * tm

        # ---- Activations: skip the pad copy when already aligned. ----
        if N == Np and D == Dp and x2.dtype == jnp.dtype(compute_dtype):
            x_in = x2
        elif N == Np and D == Dp:
            x_in = x2.astype(compute_dtype)
        else:
            x_in = jnp.zeros((Np, Dp), dtype=compute_dtype).at[:N, :D].set(
                x2.astype(compute_dtype))

        cost = pl.CostEstimate(
            flops=4 * Np * Dp * Dp,
            transcendentals=Np * Dp,
            bytes_accessed=Np * Dp * (cbytes + obytes) + 2 * Dp * Dp * cbytes + 8 * Dp,
        )

        if resident:
            out = pl.pallas_call(
                partial(_ffn_kernel_resident, gelu=gelu),
                out_shape=jax.ShapeDtypeStruct((Np, Dp), out_dt),
                grid_spec=pltpu.PrefetchScalarGridSpec(
                    num_scalar_prefetch=0,
                    grid=(Np // tm,),
                    in_specs=[
                        pl.BlockSpec((tm, Dp), lambda i: (i, 0)),   # x token tile
                        pl.BlockSpec((Dp, Dp), lambda i: (0, 0)),   # W1^T (VMEM-resident)
                        pl.BlockSpec((1, Dp), lambda i: (0, 0)),    # b1 (f32, resident)
                        pl.BlockSpec((Dp, Dp), lambda i: (0, 0)),   # W2^T (VMEM-resident)
                        pl.BlockSpec((1, Dp), lambda i: (0, 0)),    # b2 (f32, resident)
                    ],
                    out_specs=pl.BlockSpec((tm, Dp), lambda i: (i, 0)),
                ),
                compiler_params=pltpu.CompilerParams(
                    dimension_semantics=("parallel",),
                    vmem_limit_bytes=int(vmem_limit_bytes),
                ),
                cost_estimate=cost,
                interpret=interpret,
            )(x_in, w1t, b1p, w2t, b2p)
        else:
            out = pl.pallas_call(
                partial(_ffn_kernel_chunked, gelu=gelu),
                out_shape=jax.ShapeDtypeStruct((Np, Dp), out_dt),
                grid_spec=pltpu.PrefetchScalarGridSpec(
                    num_scalar_prefetch=0,
                    grid=(Np // tm, Dp // th),
                    in_specs=[
                        pl.BlockSpec((tm, Dp), lambda i, k: (i, 0)),   # x (held over k)
                        pl.BlockSpec((Dp, th), lambda i, k: (0, k)),   # W1^T hidden chunk
                        pl.BlockSpec((1, th), lambda i, k: (0, k)),    # b1 chunk (f32)
                        pl.BlockSpec((th, Dp), lambda i, k: (k, 0)),   # W2^T hidden chunk
                        pl.BlockSpec((1, Dp), lambda i, k: (0, 0)),    # b2 (f32)
                    ],
                    out_specs=pl.BlockSpec((tm, Dp), lambda i, k: (i, 0)),
                    scratch_shapes=[pltpu.VMEM((tm, Dp), jnp.float32)],  # f32 accumulator
                ),
                compiler_params=pltpu.CompilerParams(
                    dimension_semantics=("parallel", "arbitrary"),
                    vmem_limit_bytes=int(vmem_limit_bytes),
                ),
                cost_estimate=cost,
                interpret=interpret,
            )(x_in, w1t, b1p, w2t, b2p)

        if N != Np or D != Dp:
            out = out[:N, :D]
        return out.reshape(orig_shape)

    return forward


def feed_forward_pallas(x, w1, b1, w2, b2, **kwargs):
    """One-shot convenience wrapper (prefer make_feed_forward to cache weight prep)."""
    return make_feed_forward(w1, b1, w2, b2, **kwargs)(x)


def feed_forward_ref(x, w1, b1, w2, b2):
    """Pure-JAX f32 reference matching the torch module."""
    h = x @ w1.T + b1
    h = 0.5 * h * (1.0 + jax.lax.erf(h / jnp.sqrt(2.0)))
    return h @ w2.T + b2


if __name__ == "__main__":
    # Shapes implied by the module: x is (batch, seq, num_feature).
    B, S, D = 2, 8, 32
    key = jax.random.PRNGKey(0)
    kx, kw1, kb1, kw2, kb2 = jax.random.split(key, 5)

    x = jax.random.normal(kx, (B, S, D), dtype=jnp.float32)

    # nn.Linear(D, D) parameter shapes: weight (out, in) = (D, D), bias (D,)
    bound = 1.0 / math.sqrt(D)
    w1 = jax.random.uniform(kw1, (D, D), jnp.float32, -bound, bound)
    b1 = jax.random.uniform(kb1, (D,), jnp.float32, -bound, bound)
    w2 = jax.random.uniform(kw2, (D, D), jnp.float32, -bound, bound)
    b2 = jax.random.uniform(kb2, (D,), jnp.float32, -bound, bound)

    ref = feed_forward_ref(x, w1, b1, w2, b2)

    # f32-operand path: exact parity with the torch-f32 module (exact-erf GELU).
    ff_f32 = make_feed_forward(w1, b1, w2, b2, compute_dtype=jnp.float32)
    out_f32 = jax.block_until_ready(ff_f32(x))
    assert out_f32.shape == (B, S, D)
    assert jnp.allclose(out_f32, ref, atol=1e-5, rtol=1e-5), "f32 mismatch vs reference"

    # bf16-operand / f32-accumulate path (the performance configuration).
    ff_bf16 = make_feed_forward(w1, b1, w2, b2, compute_dtype=jnp.bfloat16)
    out_bf16 = jax.block_until_ready(ff_bf16(x))
    assert out_bf16.shape == (B, S, D)
    assert jnp.allclose(out_bf16, ref, atol=3e-2, rtol=3e-2), "bf16 mismatch vs reference"

    print("KERNEL_OK")
</pallas_src>

<mosaic_0001>
module attributes {stable_mosaic.version = 11 : i64} {
  func.func @_ffn_kernel_resident(%arg0: i32, %arg1: memref<8x128xf32, #tpu.memory_space<vmem>>, %arg2: memref<128x128xf32, #tpu.memory_space<vmem>>, %arg3: memref<1x128xf32, #tpu.memory_space<vmem>>, %arg4: memref<128x128xf32, #tpu.memory_space<vmem>>, %arg5: memref<1x128xf32, #tpu.memory_space<vmem>>, %arg6: memref<8x128xf32, #tpu.memory_space<vmem>>) attributes {dimension_semantics = [#tpu.dimension_semantics<parallel>], iteration_bounds = array<i64: 2>, scalar_prefetch = 0 : i64, scratch_operands = 0 : i64, tpu.core_type = #tpu.core_type<tc>, window_params = [{transform_indices = @transform_0, window_bounds = array<i64: 8, 128>}, {pipeline_mode = #tpu.pipeline_mode<synchronous>, transform_indices = @transform_1, window_bounds = array<i64: 128, 128>}, {pipeline_mode = #tpu.pipeline_mode<synchronous>, transform_indices = @transform_2, window_bounds = array<i64: 1, 128>}, {pipeline_mode = #tpu.pipeline_mode<synchronous>, transform_indices = @transform_3, window_bounds = array<i64: 128, 128>}, {pipeline_mode = #tpu.pipeline_mode<synchronous>, transform_indices = @transform_4, window_bounds = array<i64: 1, 128>}, {transform_indices = @transform_5, window_bounds = array<i64: 8, 128>}]} {
    %c0 = arith.constant 0 : index
    %c0_0 = arith.constant 0 : index
    %0 = vector.load %arg1[%c0, %c0_0] : memref<8x128xf32, #tpu.memory_space<vmem>>, vector<8x128xf32>
    %c0_1 = arith.constant 0 : index
    %c0_2 = arith.constant 0 : index
    %1 = vector.load %arg2[%c0_1, %c0_2] : memref<128x128xf32, #tpu.memory_space<vmem>>, vector<128x128xf32>
    %cst = arith.constant dense<0.000000e+00> : vector<8x128xf32>
    %2 = tpu.matmul %0, %1, %cst {dimension_numbers = #tpu.dot_dimension_numbers<[1], [0], [0], [1], [0, 0, 1, 1], [], []>} : vector<8x128xf32>, vector<128x128xf32>, vector<8x128xf32> -> vector<8x128xf32>
    %c0_3 = arith.constant 0 : index
    %c0_4 = arith.constant 0 : index
    %3 = vector.load %arg3[%c0_3, %c0_4] : memref<1x128xf32, #tpu.memory_space<vmem>>, vector<1x128xf32>
    %4 = vector.broadcast %3 : vector<1x128xf32> to vector<8x128xf32>
    %5 = arith.addf %2, %4 : vector<8x128xf32>
    %cst_5 = arith.constant 5.000000e-01 : f32
    %6 = vector.broadcast %cst_5 : f32 to vector<8x128xf32>
    %7 = arith.mulf %6, %5 : vector<8x128xf32>
    %cst_6 = arith.constant 0.707106769 : f32
    %8 = vector.broadcast %cst_6 : f32 to vector<8x128xf32>
    %9 = arith.mulf %5, %8 : vector<8x128xf32>
    %10 = math.erf %9 : vector<8x128xf32>
    %cst_7 = arith.constant 1.000000e+00 : f32
    %11 = vector.broadcast %cst_7 : f32 to vector<8x128xf32>
    %12 = arith.addf %11, %10 : vector<8x128xf32>
    %13 = arith.mulf %7, %12 : vector<8x128xf32>
    %c0_8 = arith.constant 0 : index
    %c0_9 = arith.constant 0 : index
    %14 = vector.load %arg4[%c0_8, %c0_9] : memref<128x128xf32, #tpu.memory_space<vmem>>, vector<128x128xf32>
    %cst_10 = arith.constant dense<0.000000e+00> : vector<8x128xf32>
    %15 = tpu.matmul %13, %14, %cst_10 {dimension_numbers = #tpu.dot_dimension_numbers<[1], [0], [0], [1], [0, 0, 1, 1], [], []>} : vector<8x128xf32>, vector<128x128xf32>, vector<8x128xf32> -> vector<8x128xf32>
    %c0_11 = arith.constant 0 : index
    %c0_12 = arith.constant 0 : index
    %16 = vector.load %arg5[%c0_11, %c0_12] : memref<1x128xf32, #tpu.memory_space<vmem>>, vector<1x128xf32>
    %17 = vector.broadcast %16 : vector<1x128xf32> to vector<8x128xf32>
    %18 = arith.addf %15, %17 : vector<8x128xf32>
    %c0_13 = arith.constant 0 : index
    %c0_14 = arith.constant 0 : index
    %19 = vector.load %arg6[%c0_13, %c0_14] : memref<8x128xf32, #tpu.memory_space<vmem>>, vector<8x128xf32>
    tpu.vector_store %arg6[%c0_13, %c0_14], %18 {strides = array<i32>} : memref<8x128xf32, #tpu.memory_space<vmem>>, vector<8x128xf32>,
    return
  }
  func.func @transform_0(%arg0: i32) -> (i32, i32) {
    %c0_i32 = arith.constant 0 : i32
    %c0_i32_0 = arith.constant 0 : i32
    return %arg0, %c0_i32 : i32, i32
  }
  func.func @transform_1(%arg0: i32) -> (i32, i32) {
    %c0_i32 = arith.constant 0 : i32
    %c0_i32_0 = arith.constant 0 : i32
    %c0_i32_1 = arith.constant 0 : i32
    return %c0_i32, %c0_i32_0 : i32, i32
  }
  func.func @transform_2(%arg0: i32) -> (i32, i32) {
    %c0_i32 = arith.constant 0 : i32
    %c0_i32_0 = arith.constant 0 : i32
    %c0_i32_1 = arith.constant 0 : i32
    return %c0_i32, %c0_i32_0 : i32, i32
  }
  func.func @transform_3(%arg0: i32) -> (i32, i32) {
    %c0_i32 = arith.constant 0 : i32
    %c0_i32_0 = arith.constant 0 : i32
    %c0_i32_1 = arith.constant 0 : i32
    return %c0_i32, %c0_i32_0 : i32, i32
  }
  func.func @transform_4(%arg0: i32) -> (i32, i32) {
    %c0_i32 = arith.constant 0 : i32
    %c0_i32_0 = arith.constant 0 : i32
    %c0_i32_1 = arith.constant 0 : i32
    return %c0_i32, %c0_i32_0 : i32, i32
  }
  func.func @transform_5(%arg0: i32) -> (i32, i32) {
    %c0_i32 = arith.constant 0 : i32
    %c0_i32_0 = arith.constant 0 : i32
    return %arg0, %c0_i32 : i32, i32
  }
}

</mosaic_0001>

<bundles_post_ra>
// kernel: tpu_custom_call.1
= control target key start
LH: loop header
LB: loop body
LE: loop exit
PB: predicated region body
PF: predicated region fallthrough
CT: control target
= control target key end

     0   :  { %10 = vsyncpa [#allocation3], 0  ;;  %s1264_s0 = inlined_call_operand.hbm [shape: f32[16,128], index: 0, kind: input, shape index: {}]   ;;  %s1265_s1 = inlined_call_operand.hbm [shape: f32[128,128], index: 1, kind: input, shape index: {}]   ;;  %s1266_s2 = inlined_call_operand.vmem [shape: f32[1,128], index: 2, kind: input, shape index: {}]   ;;  %s1267_s3 = inlined_call_operand.hbm [shape: f32[128,128], index: 3, kind: input, shape index: {}]   ;;  %s1268_s4 = inlined_call_operand.vmem [shape: f32[1,128], index: 4, kind: input, shape index: {}]   ;;  %s1269_s5 = inlined_call_operand.hbm [shape: f32[16,128], index: 5, kind: output, shape index: {}]  }
   0x1   :  { %12 = vsyncpa [#allocation3 + $0x1], 0 }
   0x2   :  { %13 = vsyncpa [#allocation6], 0 }
   0x3   :  { %14 = vsyncpa [#allocation4], 0 }
   0x4   :  { %16 = vsyncpa [#allocation4 + $0x1], 0  ;;  %s1006_s18 = smov 0   ;;  %s1008_s19 = smov 0  }
   0x5   :  { %s1010_s20 = smov 0   ;;  %s1012_s21 = smov 0  }
   0x6 LB: > { %s1027_s22 = sadd.s32 4294967295, %s965_s21   ;;  %s565_s23 = sadd.s32 4294967294, %s965_s21   ;;  %s965_s21 = sphi %s1012_s21, %s1289_s21   ;;  %s961_s20 = sphi %s1010_s20, %s1288_s20   ;;  %s957_s19 = sphi %s1008_s19, %s1287_s19   ;;  %s953_s18 = sphi %s1006_s18, %s1286_s18  }
   0x7   : > { %p42_p0 = scmp.ne.s32.totalorder %s957_s19, %s953_s18  ;;  %p1270_p1 = scmp.eq.s32.totalorder %s1027_s22, 0 }
   0x8   : > { %p156_p3 = scmp.eq.s32.totalorder %s565_s23, 1  ;;  %p566_p5 = scmp.ge.s32.totalorder %s965_s21, 1 }
   0x9   : > { %p1036_p4 = por %p1270_p1, %p42_p0  ;;  %p163_p7 = scmp.lt.s32.totalorder %s965_s21, 3 }
   0xa   : > { %p1041_p6 = por %p156_p3, %p42_p0  ;;  %s967_s27 = smov [#allocation5]  }
   0xb   : > { %s1273_s24 = scalar_select %p1036_p4, 1, 0 }
   0xc   : > { %s1274_s25 = scalar_select %p1041_p6, 1, 0 }
   0xd   : > { %p1046_p8 = pnand %p566_p5, %p163_p7  ;;  %s175_s28 = sshll.u32 %s967_s27, 4  ;;  %s1050_s28 = int_to_ptr.vmem [resolvable:$true] %s175_s28 }
   0xe   : > { %s968_s30 = smov [#allocation7]   ;;  %s809_s9 = scalar_lea.hbm %s1265_s1, 2048 }
   0xf   : > { %p747_p9 = pneg %p1046_p8  ;;  %s191_s6 = sshll.u32 %s968_s30, 4  ;;  %s1061_s6 = int_to_ptr.vmem [resolvable:$true] %s191_s6 }
  0x10   : > { %p810_p12 = scmp.ne.s32.totalorder %s1265_s1, %s809_s9  ;;  %p816_p5 = scmp.lt.u32.totalorder %s809_s9, %s1265_s1 }
  0x11   : > { %p1057_p11 = pnand %p747_p9, %p1270_p1 }
  0x13   : > { %p811_p13 = pneg %p1057_p11 }
  0x15   : > { %p812_p0 = pnand %p811_p13, %p810_p12 }
  0x17   : > { %p813_p3 = pneg %p812_p0 }
  0x19   : > { %p818_p7 = pnand %p816_p5, %p813_p3 }
  0x1b   : > { %821 = shalt.err (!%p818_p7)
}
  0x1c   : > { %s822_s14 = scalar_lea.vmem %s1050_s28, 2048  ;;  %p830_p2 = scmp.lt.s32.totalorder %s1050_s28, %s1050_s28 }
  0x1d   : > { %p823_p9 = scmp.ne.s32.totalorder %s1050_s28, %s822_s14  ;;  %p831_p12 = scmp.lt.s32.totalorder %s822_s14, %s822_s14 }
  0x1f   : > { %p825_p10 = pnand %p823_p9, %p811_p13  ;;  %p832_p0 = por %p831_p12, %p830_p2 }
  0x21   : > { %p826_p1 = pneg %p825_p10 }
  0x23   : > { %p833_p6 = pnand %p832_p0, %p826_p1 }
  0x25   : > { %836 = shalt.err (!%p833_p6)
}
  0x26   : > { %s969_s15 = smov 128   ;;  %s970_s16 = smov 8  }
  0x27   : > { %750 = dma.hbm_to_vmem [thread:$0]  (!%p1057_p11), %s1265_s1, 2048, %s1050_s28, [#allocation6], %s969_s15, %s969_s15, %s970_s16  }
  0x28   : > { %s837_s7 = scalar_lea.hbm %s1267_s3, 2048 }
  0x29   : > { %p838_p2 = scmp.ne.s32.totalorder %s1267_s3, %s837_s7  ;;  %p844_p10 = scmp.lt.u32.totalorder %s837_s7, %s1267_s3 }
  0x2b   : > { %p840_p1 = pnand %p838_p2, %p811_p13 }
  0x2d   : > { %p841_p6 = pneg %p840_p1 }
  0x2f   : > { %p846_p3 = pnand %p844_p10, %p841_p6 }
  0x31   : > { %849 = shalt.err (!%p846_p3)
}
  0x32   : > { %s850_s28 = scalar_lea.vmem %s1061_s6, 2048  ;;  %p858_p12 = scmp.lt.s32.totalorder %s1061_s6, %s1061_s6 }
  0x33   : > { %p851_p5 = scmp.ne.s32.totalorder %s1061_s6, %s850_s28  ;;  %p859_p0 = scmp.lt.s32.totalorder %s850_s28, %s850_s28 }
  0x35   : > { %p853_p7 = pnand %p851_p5, %p811_p13  ;;  %p860_p2 = por %p859_p0, %p858_p12 }
  0x37   : > { %p854_p9 = pneg %p853_p7 }
  0x39   : > { %p861_p1 = pnand %p860_p2, %p854_p9 }
  0x3b   : > { %864 = shalt.err (!%p861_p1)
}
  0x3c   : > { %753 = dma.hbm_to_vmem [thread:$0]  (!%p1057_p11), %s1267_s3, 2048, %s1061_s6, [#allocation6], %s969_s15, %s969_s15, %s970_s16  }
  0x3d   : > { %s1116_s14 = sadd.s32 1, %s965_s21   ;;  %s29_s29 = sadd.s32 1, %s961_s20 }
  0x3e   : > { %s26_s17 = ssub.s32 %s965_s21, %s1116_s14  ;;  %p36_p13 = scmp.ne.s32.totalorder %s961_s20, %s957_s19 }
  0x3f   : > { %p27_p6 = scmp.eq.s32.totalorder %s26_s17, 0  ;;  %p37_p10 = scmp.eq.s32.totalorder %s965_s21, 0 }
  0x40   : > { %p1277_p3 = scmp.eq.s32.totalorder %s1027_s22, 1  ;;  %p764_p7 = scmp.lt.s32.totalorder %s965_s21, 2 }
  0x41   : > { %s1132_s27 = scalar_select %p27_p6, %s961_s20, %s29_s29  }
  0x42   : > { %p1126_p5 = por %p1277_p3, %p36_p13  ;;  %p38_p9 = por %p37_p10, %p36_p13 }
  0x43   : > { %s208_s30 = sand.u32 1, %s961_s20   ;;  %s571_s6 = sshll.u32 %s965_s21, 7 }
  0x44   : > { %s1278_s23 = scalar_select %p1126_p5, 1, 0 }
  0x45   : > { %s570_s7 = sshll.u32 %s208_s30, 3  ;;  %s1139_s8 = scalar_lea.hbm %s1264_s0, %s571_s6 }
  0x46   : > { %s212_s9 = scalar_lea.vmem [#allocation2], %s570_s7  ;;  %p1143_p11 = pnand %p764_p7, %p38_p9 }
  0x47   : > { %s219_s10 = sshll.u32 %s212_s9, 4  ;;  %s209_s28 = scalar_lea.sflag [#allocation3], %s208_s30  ;;  %s1141_s10 = int_to_ptr.vmem [resolvable:$true] %s219_s10 }
  0x48   : > { %s865_s12 = scalar_lea.hbm %s1139_s8, 128  ;;  %p867_p0 = pneg %p1143_p11 }
  0x49   : > { %p866_p12 = scmp.ne.s32.totalorder %s1139_s8, %s865_s12  ;;  %s870_s17 = scalar_lea.hbm %s1264_s0, 256 }
  0x4a   : > { %p871_p13 = scmp.lt.u32.totalorder %s1139_s8, %s1264_s0  ;;  %p872_p6 = scmp.lt.u32.totalorder %s870_s17, %s865_s12 }
  0x4b   : > { %p868_p2 = pnand %p867_p0, %p866_p12  ;;  %p874_p3 = scmp.lt.u32.totalorder %s865_s12, %s1139_s8 }
  0x4c   : > { %p873_p10 = por %p872_p6, %p871_p13 }
  0x4d   : > { %p869_p1 = pneg %p868_p2 }
  0x4e   : > { %p875_p7 = por %p874_p3, %p873_p10 }
  0x50   : > { %p876_p9 = pnand %p875_p7, %p869_p1 }
  0x52   : > { %879 = shalt.err (!%p876_p9)
}
  0x53   : > { %s880_s30 = scalar_lea.vmem %s1141_s10, 128  ;;  %s971_s15 = smov [#allocation2]  }
  0x54   : > { %p881_p12 = scmp.ne.s32.totalorder %s1141_s10, %s880_s30  ;;  %s885_s16 = sshll.u32 %s971_s15, 4  ;;  %s886_s16 = int_to_ptr.vmem [resolvable:$false] %s885_s16 }
  0x55   : > { %s887_s9 = scalar_lea.vmem %s886_s16, 256  ;;  %p888_p4 = scmp.lt.s32.totalorder %s1141_s10, %s886_s16 }
  0x56   : > { %p883_p2 = pnand %p881_p12, %p867_p0  ;;  %p889_p13 = scmp.lt.s32.totalorder %s887_s9, %s880_s30 }
  0x58   : > { %p884_p5 = pneg %p883_p2  ;;  %p890_p6 = por %p889_p13, %p888_p4 }
  0x5a   : > { %p891_p10 = pnand %p890_p6, %p884_p5 }
  0x5c   : > { %894 = shalt.err (!%p891_p10)
}
  0x5d   : > { %757 = dma.hbm_to_vmem [thread:$0]  (!%p1143_p11), %s1139_s8, 128, %s1141_s10, %s209_s28  }
  0x5e   : > { %228 = sbr.rel (%p1046_p8) target bundleno = 598 (0x256), region = 40  ;;  %s1175_s12 = sand.u32 (!%p1046_p8), 1, %s957_s19  }
  0x5f   : > { %s573_s13 = sshll.u32 (!%p1046_p8), %s1175_s12, 3  ;;  %s231_s29 = scalar_lea.sflag (!%p1046_p8), [#allocation3], %s1175_s12 }
  0x60   : > { %s1181_s17 = scalar_lea.vmem (!%p1046_p8), [#allocation2], %s573_s13  ;;  %p1280_p4 = scmp.ne.s32.totalorder (!%p1046_p8), %s1273_s24, 0 }
  0x65   : > { %940 = dma.done.wait (%p1280_p4), %s231_s29, 128  }
  0x66   : > { %942 = vsyncadd (%p1280_p4), %s231_s29, 4294967168  ;;  %p1281_p5 = scmp.eq.s32.totalorder %s1027_s22, 0 }
  0x68   : > { %944 = dma.done.wait (%p1281_p5), [#allocation6], 4096   ;;  %p1282_p8 = pmov %p1281_p5 }
  0x69   : > { %v972_v0 = vmov 0.0|0.0   ;;  %vm973_vm0 = vmmov 0   ;;  %v974_v1 = vmov 0.0   ;;  %v270_v2 = vld [vmem:[#allocation5] sm:$0xff]  ;;  %v271_v3 = vld [vmem:[#allocation5 + $0x8] sm:$0xff]  ;;  %v272_v4 = vld [vmem:[#allocation5 + $0x10] sm:$0xff] }
  0x6a   : > { %946 = vsyncadd (%p1282_p8), [#allocation6], 4294963200  ;;  %687 = vmatprep.subr.bf16.mxu0 %v972_v0  ;;  %649 = vmatprep.mubr.msk.f32.mxu0 %vm973_vm0, %v974_v1  ;;  %v688_v5 = vpack.c.bf16 %v271_v3, %v270_v2  ;;  %v273_v6 = vld [vmem:[#allocation5 + $0x18] sm:$0xff]  ;;  %v274_v8 = vld [vmem:[#allocation5 + $0x20] sm:$0xff]  ;;  %s580_s11 = sshll.u32 %s1027_s22, 7  ;;  %s268_s28 = scalar_lea.vmem [#allocation8], %s573_s13 }
  0x6b   : > { %711 = vmatprep.subr.bf16.mxu1 %v972_v0  ;;  %684 = vmatprep.mubr.msk.f32.mxu1 %vm973_vm0, %v974_v1  ;;  %v691_v7 = vpack.c.bf16 %v273_v6, %v272_v4  ;;  %v275_v9 = vld [vmem:[#allocation5 + $0x28] sm:$0xff]  ;;  %v368_v10 = vld [vmem:[#allocation7] sm:$0xff]  ;;  %v370_v12 = vld [vmem:[#allocation7 + $0x10] sm:$0xff]  ;;  %s476_s7 = sshll.u32 %s268_s28, 4  ;;  %s1220_s15 = scalar_lea.hbm %s1269_s5, %s580_s11  ;;  %s1222_s7 = int_to_ptr.vmem [resolvable:$true] %s476_s7 }
  0x6c   : > { %689 = vmatpush3.bf16.msra.mxu0 %v688_v5  ;;  %v369_v11 = vld [vmem:[#allocation7 + $0x8] sm:$0xff]  ;;  %v371_v13 = vld [vmem:[#allocation7 + $0x18] sm:$0xff]  ;;  %v694_v14 = vpack.c.bf16 %v275_v9, %v274_v8  ;;  %v276_v16 = vld [vmem:[#allocation5 + $0x30] sm:$0xff]  ;;  %s463_s16 = scalar_lea.sflag [#allocation4], %s1175_s12  ;;  %s895_s9 = scalar_lea.vmem %s1222_s7, 128 }
  0x6d   : > { %690 = vmatprep.subr.bf16.mxu0 %v972_v0  ;;  %v712_v15 = vpack.c.bf16 %v369_v11, %v368_v10  ;;  %v277_v17 = vld [vmem:[#allocation5 + $0x38] sm:$0xff]  ;;  %v715_v18 = vpack.c.bf16 %v371_v13, %v370_v12  ;;  %v372_v19 = vld [vmem:[#allocation7 + $0x20] sm:$0xff]  ;;  %v373_v20 = vld [vmem:[#allocation7 + $0x28] sm:$0xff]  ;;  %p896_p11 = scmp.ne.s32.totalorder %s1222_s7, %s895_s9  ;;  %p1283_p0 = scmp.ne.s32.totalorder %s1278_s23, 0 }
  0x6e   : > { %v697_v21 = vpack.c.bf16 %v277_v17, %v276_v16  ;;  %v278_v22 = vld [vmem:[#allocation5 + $0x40] sm:$0xff]  ;;  %v279_v23 = vld [vmem:[#allocation5 + $0x48] sm:$0xff]  ;;  %v718_v24 = vpack.c.bf16 %v373_v20, %v372_v19  ;;  %v280_v26 = vld [vmem:[#allocation5 + $0x50] sm:$0xff]  ;;  %s975_s22 = smov [#allocation8]  }
  0x6f   : > { %713 = vmatpush3.bf16.msra.mxu1 %v712_v15  ;;  %v700_v25 = vpack.c.bf16 %v279_v23, %v278_v22  ;;  %v281_v27 = vld [vmem:[#allocation5 + $0x58] sm:$0xff]  ;;  %v282_v29 = vld [vmem:[#allocation5 + $0x60] sm:$0xff]  ;;  %v283_v30 = vld [vmem:[#allocation5 + $0x68] sm:$0xff]  ;;  %p897_p1 = pnand %p896_p11, %p1283_p0  ;;  %s899_s13 = sshll.u32 %s975_s22, 4  ;;  %s900_s13 = int_to_ptr.vmem [resolvable:$false] %s899_s13 }
  0x70   : > { %692 = vmatpush3.bf16.msra.mxu0 %v691_v7  ;;  %714 = vmatprep.subr.bf16.mxu1 %v972_v0  ;;  %v703_v28 = vpack.c.bf16 %v281_v27, %v280_v26  ;;  %v706_v31 = vpack.c.bf16 %v283_v30, %v282_v29  ;;  %v284_v32 = vld [vmem:[#allocation5 + $0x70] sm:$0xff]  ;;  %v285_v33 = vld [vmem:[#allocation5 + $0x78] sm:$0xff]  ;;  %v376_v39 = vld [vmem:[#allocation7 + $0x40] sm:$0xff]  ;;  %s901_s29 = scalar_lea.vmem %s900_s13, 256  ;;  %p902_p7 = scmp.lt.s32.totalorder %s1222_s7, %s900_s13 }
  0x71   : > { %693 = vmatprep.subr.bf16.mxu0 %v972_v0  ;;  %v709_v34 = vpack.c.bf16 %v285_v33, %v284_v32  ;;  %v269_v35 = vld [vmem:[%s1181_s17] sm:$0xff]  ;;  %v377_v40 = vld [vmem:[#allocation7 + $0x48] sm:$0xff]  ;;  %v380_v45 = vld [vmem:[#allocation7 + $0x60] sm:$0xff]  ;;  %p898_p3 = pneg %p897_p1  ;;  %p903_p9 = scmp.lt.s32.totalorder %s901_s29, %s895_s9 }
  0x72   : > { %v374_v36 = vld [vmem:[#allocation7 + $0x30] sm:$0xff]  ;;  %v375_v37 = vld [vmem:[#allocation7 + $0x38] sm:$0xff]  ;;  %v724_v41 = vpack.c.bf16 %v377_v40, %v376_v39  ;;  %v381_v46 = vld [vmem:[#allocation7 + $0x68] sm:$0xff] }
  0x73   : > { %716 = vmatpush3.bf16.msra.mxu1 %v715_v18  ;;  %v721_v38 = vpack.c.bf16 %v375_v37, %v374_v36  ;;  %v378_v42 = vld [vmem:[#allocation7 + $0x50] sm:$0xff]  ;;  %v379_v43 = vld [vmem:[#allocation7 + $0x58] sm:$0xff]  ;;  %v730_v47 = vpack.c.bf16 %v381_v46, %v380_v45  ;;  %p904_p12 = por %p903_p9, %p902_p7 }
  0x74   : > { %695 = vmatpush3.bf16.msra.mxu0 %v694_v14  ;;  %717 = vmatprep.subr.bf16.mxu1 %v972_v0  ;;  %v727_v44 = vpack.c.bf16 %v379_v43, %v378_v42  ;;  %v382_v48 = vld [vmem:[#allocation7 + $0x70] sm:$0xff]  ;;  %v383_v49 = vld [vmem:[#allocation7 + $0x78] sm:$0xff] }
  0x75   : > { %696 = vmatprep.subr.bf16.mxu0 %v972_v0  ;;  %v733_v50 = vpack.c.bf16 %v383_v49, %v382_v48  ;;  %v577_v51 = vld [vmem:[%s1266_s2] ss:$0 sm:$0xff]  ;;  %p905_p2 = pnand %p904_p12, %p898_p3 }
  0x76   : > { %v578_v60 = vld [vmem:[%s1268_s4] ss:$0 sm:$0xff] }
  0x77   : > { %719 = vmatpush3.bf16.msra.mxu1 %v718_v24 }
  0x78   : > { %698 = vmatpush3.bf16.msra.mxu0 %v697_v21  ;;  %720 = vmatprep.subr.bf16.mxu1 %v972_v0 }
  0x79   : > { %699 = vmatprep.subr.bf16.mxu0 %v972_v0 }
  0x7b   : > { %722 = vmatpush3.bf16.msra.mxu1 %v721_v38 }
  0x7c   : > { %701 = vmatpush3.bf16.msra.mxu0 %v700_v25  ;;  %723 = vmatprep.subr.bf16.mxu1 %v972_v0 }
  0x7d   : > { %702 = vmatprep.subr.bf16.mxu0 %v972_v0 }
  0x7f   : > { %725 = vmatpush3.bf16.msra.mxu1 %v724_v41 }
  0x80   : > { %704 = vmatpush3.bf16.msra.mxu0 %v703_v28  ;;  %726 = vmatprep.subr.bf16.mxu1 %v972_v0 }
  0x81   : > { %705 = vmatprep.subr.bf16.mxu0 %v972_v0 }
  0x83   : > { %728 = vmatpush3.bf16.msra.mxu1 %v727_v44 }
  0x84   : > { %707 = vmatpush3.bf16.msra.mxu0 %v706_v31  ;;  %729 = vmatprep.subr.bf16.mxu1 %v972_v0 }
  0x85   : > { %708 = vmatprep.subr.bf16.mxu0 %v972_v0 }
  0x87   : > { %731 = vmatpush3.bf16.msra.mxu1 %v730_v47 }
  0x88   : > { %710 = vmatpush3.bf16.msra.mxu0 %v709_v34  ;;  %732 = vmatprep.subr.bf16.mxu1 %v972_v0 }
  0x8b   : > { %650 = vmatmul.mubr.f32.vlgmr.msra.gmra.mrb[0].mxu0 %v269_v35  ;;  %734 = vmatpush3.bf16.msra.mxu1 %v733_v50 }
 0x15e   : > { %v359_v52 = vpop.f32.mrb[0].mxu0 }
 0x15f   : > { %v360_v53 = vadd.f32 %v577_v51, %v359_v52  ;;  %v651_v54 = vpop.f32.mrb[1].mxu0 }
 0x161   : > { %v364_v55 = vmul.f32 0.70710677, %v360_v53  ;;  %v363_v57 = vmul.f32 0.5, %v360_v53 }
 0x163   : > { %807 = verf.f32 %v364_v55 }
 0x16d   : > { %v808_v56 = vpop.eup %807 }
 0x16e   : > { %v366_v58 = vadd.f32 1.0, %v808_v56 }
 0x170   : > { %v367_v59 = vmul.f32 %v366_v58, %v363_v57 }
 0x172   : > { %685 = vmatmul.mubr.f32.vlgmr.msra.gmra.mrb[0].mxu1 %v367_v59 }
 0x245   : > { %v457_v61 = vpop.f32.mrb[0].mxu1 }
 0x246   : > { %v458_v62 = vadd.f32 %v578_v60, %v457_v61  ;;  %v686_v63 = vpop.f32.mrb[1].mxu1 }
 0x248   : > { %461 = vst [vmem:[%s268_s28] sm:$0xff] %v458_v62 }
 0x249   : > { %908 = shalt.err (!%p905_p2)
}
 0x24a   : > { %s909_s12 = scalar_lea.hbm %s1220_s15, 128  ;;  %s913_s26 = scalar_lea.hbm %s1269_s5, 256 }
 0x24b   : > { %p910_p13 = scmp.ne.s32.totalorder %s1220_s15, %s909_s12  ;;  %p914_p4 = scmp.lt.u32.totalorder %s1220_s15, %s1269_s5 }
 0x24c   : > { %p915_p5 = scmp.lt.u32.totalorder %s913_s26, %s909_s12  ;;  %p917_p11 = scmp.lt.u32.totalorder %s909_s12, %s1220_s15 }
 0x24d   : > { %p911_p6 = pnand %p910_p13, %p1283_p0 }
 0x24e   : > { %p916_p8 = por %p915_p5, %p914_p4 }
 0x24f   : > { %p912_p10 = pneg %p911_p6 }
 0x250   : > { %p918_p1 = por %p917_p11, %p916_p8 }
 0x252   : > { %p919_p3 = pnand %p918_p1, %p912_p10 }
 0x254   : > { %922 = shalt.err (!%p919_p3)
}
 0x255   : > { %745 = dma.vmem_to_hbm [thread:$0]  (%p1283_p0), %s1222_s7, 128, %s1220_s15, %s463_s16  }
 0x256 PF: > { %s488_s11 = sand.u32 1, %s953_s18   ;;  %p1284_p7 = scmp.ne.s32.totalorder %s1274_s25, 0 }
 0x257   : > { %p1285_p9 = scmp.ge.s32.totalorder %s965_s21, 2  ;;  %s489_s28 = scalar_lea.sflag [#allocation4], %s488_s11 }
 0x259   : > { %p759_p12 = pnand %p1285_p9, %p1284_p7 }
 0x25b   : > { %948 = dma.done.wait (!%p759_p12), %s489_s28, 128  }
 0x25c   : > { %950 = vsyncadd (!%p759_p12), %s489_s28, 4294967168  ;;  %p19_p2 = scmp.ge.s32.totalorder %s1116_s14, 4   ;;  %s1286_s18 = smov %s957_s19 }
 0x25d   : > { %s1287_s19 = smov %s961_s20  ;;  %s1288_s20 = smov %s1132_s27 }
 0x25e   : > { %s1289_s21 = smov %s1116_s14  ;;  %21 = sbr.rel (!%p19_p2) target bundleno = 6 (0x6), region = 93 }
 0x265   :  { %494 = vsyncpa [#allocation3], 1 }
 0x266   :  { %496 = vsyncpa [#allocation3 + $0x1], 1 }
 0x267   :  { %497 = vsyncpa [#allocation6], 1 }
 0x268   :  { %498 = vsyncpa [#allocation4], 1 }
 0x269   :  { %500 = vsyncpa [#allocation4 + $0x1], 1 }

</bundles_post_ra>
